<compile_context>
chip_gen: v5e
topology: v5e:2x2
jax: 0.10.0
libtpu: 0.0.40
codegen_flags: <defaults>
</compile_context>

<pallas_src>
import functools

import jax
import jax.numpy as jnp
from jax import lax
from jax.experimental import pallas as pl
from jax.experimental.pallas import tpu as pltpu

BN_EPS = 1e-5   # nn.BatchNorm1d default


def _resblock_kernel(x_ref, w1_ref, b1_ref, w2_ref, b2_ref, w3_ref, b3_ref,
                     o_ref, *, nb, k, pad):
    # x_ref : (nb, c1, L)       input block, NCL-native (channels on sublanes)
    # w1_ref: (c_mid, c1)       BN-folded 1x1 conv weight
    # b1_ref: (c_mid, 1)
    # w2_ref: (k*c_mid, c_mid)  BN-folded k-tap conv, taps stacked along rows:
    #                           row d*c_mid + co  holds  w2[co, :, d]
    # b2_ref: (c_mid, 1)
    # w3_ref: (c1, c_mid)       BN-folded 1x1 conv weight
    # b3_ref: (c1, 1)
    # o_ref : (nb, c1, L)
    c_mid = w1_ref.shape[0]
    L = x_ref.shape[-1]
    cdt = w1_ref.dtype                       # matmul-operand (MXU) dtype

    w1 = w1_ref[...]
    w2 = w2_ref[...]
    w3 = w3_ref[...]
    b1 = b1_ref[...]
    b2 = b2_ref[...]
    b3 = b3_ref[...]

    def one_sample(i):
        xi = x_ref[i]                                    # (c1, L)
        if xi.dtype != cdt:
            xi = xi.astype(cdt)

        # ---- layer 1: 1x1 conv (BN folded) + ReLU --------------------------------
        h1 = jnp.dot(w1, xi, preferred_element_type=jnp.float32)
        h1 = jnp.maximum(h1 + b1, 0.0).astype(cdt)       # (c_mid, L)

        # ---- layer 2: k-tap "same" conv = ONE stacked matmul + shift-combine ------
        y = jnp.dot(w2, h1, preferred_element_type=jnp.float32)   # (k*c_mid, L) f32
        acc = y[pad * c_mid:(pad + 1) * c_mid, :]                  # center tap d==pad
        for d in range(k):                               # static unroll, k = 5
            if d == pad:
                continue
            yd = y[d * c_mid:(d + 1) * c_mid, :]         # (c_mid, L), sublane-aligned
            s = pad - d                                  # shift-right amount, |s|<=pad
            if s > 0:
                shifted = jnp.concatenate(
                    [jnp.zeros((c_mid, s), jnp.float32), yd[:, :L - s]], axis=1)
            else:
                shifted = jnp.concatenate(
                    [yd[:, -s:], jnp.zeros((c_mid, -s), jnp.float32)], axis=1)
            acc = acc + shifted                          # zero-fill == conv zero-pad
        h2 = jnp.maximum(acc + b2, 0.0).astype(cdt)      # (c_mid, L)

        # ---- layer 3: 1x1 conv (BN folded) + ReLU --------------------------------
        h3 = jnp.dot(w3, h2, preferred_element_type=jnp.float32)
        h3 = jnp.maximum(h3 + b3, 0.0)                   # (c1, L) f32

        # ---- residual add: re-read x from the resident VMEM block -----------------
        o_ref[i] = (h3 + x_ref[i].astype(jnp.float32)).astype(o_ref.dtype)

    if nb == 1:
        one_sample(0)
    elif nb <= 8:
        for i in range(nb):                              # short static unroll
            one_sample(i)
    else:
        def body(i, carry):
            one_sample(i)
            return carry
        lax.fori_loop(0, nb, body, 0)


def resblock(x, params, *, k=5, pad=2, eps=BN_EPS, compute_dtype=jnp.float32):
    """x: (N, c1, L) float32 (PyTorch NCL). params: 3 tuples of
    (conv_w, conv_b, bn_gamma, bn_beta, bn_running_mean, bn_running_var).
    compute_dtype=jnp.bfloat16 puts bf16 operands on the MXU (v6e/v7x native)."""
    N, c1, L = x.shape
    c_mid = c1 // 2

    # ---- fold eval-mode BatchNorm1d into each conv (wrapper-side, negligible) ----
    def fold(w, b, g, beta, mean, var):
        scale = g * lax.rsqrt(var + eps)                       # (cout,)
        wf = w * scale.reshape((-1,) + (1,) * (w.ndim - 1))
        bf = (b - mean) * scale + beta
        return wf.astype(jnp.float32), bf.astype(jnp.float32)

    p1, p2, p3 = params
    w1f, b1f = fold(*p1)      # (c_mid, c1, 1)
    w2f, b2f = fold(*p2)      # (c_mid, c_mid, k)
    w3f, b3f = fold(*p3)      # (c1, c_mid, 1)

    w1m = w1f[:, :, 0].astype(compute_dtype)                               # (c_mid, c1)
    w2m = jnp.transpose(w2f, (2, 0, 1)).reshape(k * c_mid, c_mid)          # (k*c_mid, c_mid)
    w2m = w2m.astype(compute_dtype)
    w3m = w3f[:, :, 0].astype(compute_dtype)                               # (c1, c_mid)
    b1c = b1f.reshape(c_mid, 1)      # biases stay f32 (added after f32 accumulation)
    b2c = b2f.reshape(c_mid, 1)
    b3c = b3f.reshape(c1, 1)

    # ---- batch blocking: Nb samples per grid step (~2 MiB x block) ----------------
    bytes_per_sample = int(c1 * L * x.dtype.itemsize)
    nb = min(N, max(1, (2 << 20) // max(1, bytes_per_sample)))
    if N >= 2:
        nb = min(nb, -(-N // 2))     # keep >= 2 grid steps so v7x's 2 TCs both work
    while N % nb != 0:               # divisor of N -> no out-of-bounds garbage blocks
        nb -= 1
    grid = (N // nb,)

    kern = functools.partial(_resblock_kernel, nb=nb, k=k, pad=pad)

    flops = int(N * L * 2 * (c_mid * c1 + k * c_mid * c_mid + c1 * c_mid))
    weight_bytes = int(w1m.size * w1m.dtype.itemsize + w2m.size * w2m.dtype.itemsize
                       + w3m.size * w3m.dtype.itemsize + 4 * (2 * c_mid + c1))
    bytes_accessed = int(2 * N * c1 * L * x.dtype.itemsize + weight_bytes)

    # VMEM budget: double-buffered in/out blocks + weights + live intermediates,
    # capped at 64 MiB so the same tiling stays legal on v7x.
    block_bytes = int(nb * c1 * L * x.dtype.itemsize)
    vmem_limit = int(min(64 << 20,
                         max(16 << 20, 4 * block_bytes + 2 * weight_bytes + (8 << 20))))

    out = pl.pallas_call(
        kern,
        out_shape=jax.ShapeDtypeStruct((N, c1, L), x.dtype),
        grid_spec=pltpu.PrefetchScalarGridSpec(
            num_scalar_prefetch=0,
            grid=grid,
            in_specs=[
                pl.BlockSpec((nb, c1, L), lambda n: (n, 0, 0)),            # x block
                pl.BlockSpec((c_mid, c1), lambda n: (0, 0)),               # w1 (resident)
                pl.BlockSpec((c_mid, 1), lambda n: (0, 0)),                # b1
                pl.BlockSpec((k * c_mid, c_mid), lambda n: (0, 0)),        # w2 stacked
                pl.BlockSpec((c_mid, 1), lambda n: (0, 0)),                # b2
                pl.BlockSpec((c1, c_mid), lambda n: (0, 0)),               # w3
                pl.BlockSpec((c1, 1), lambda n: (0, 0)),                   # b3
            ],
            out_specs=pl.BlockSpec((nb, c1, L), lambda n: (n, 0, 0)),
        ),
        compiler_params=pltpu.CompilerParams(
            dimension_semantics=("parallel",),        # batch axis shards across TCs
            vmem_limit_bytes=vmem_limit),
        cost_estimate=pl.CostEstimate(
            flops=flops, transcendentals=0, bytes_accessed=bytes_accessed),
    )(x, w1m, b1c, w2m, b2c, w3m, b3c)

    return out


# ----------------------------- pure-JAX reference -----------------------------------
def _reference(x, params, *, k, pad, eps=BN_EPS):
    def conv_bn_relu(h, p, kp):
        w, b, g, beta, mean, var = p
        y = lax.conv_general_dilated(
            h, w, window_strides=(1,), padding=[(kp, kp)],
            dimension_numbers=("NCH", "OIH", "NCH"))
        y = y + b[None, :, None]
        y = (y - mean[None, :, None]) * lax.rsqrt(var[None, :, None] + eps)
        y = y * g[None, :, None] + beta[None, :, None]
        return jnp.maximum(y, 0.0)

    h = conv_bn_relu(x, params[0], 0)
    h = conv_bn_relu(h, params[1], pad)
    h = conv_bn_relu(h, params[2], 0)
    return h + x


def _make_params(key, c1, k):
    c_mid = c1 // 2
    shapes = [(c_mid, c1, 1), (c_mid, c_mid, k), (c1, c_mid, 1)]
    params = []
    for i, shp in enumerate(shapes):
        cout = shp[0]
        ks = jax.random.split(jax.random.fold_in(key, i), 6)
        w = 0.2 * jax.random.normal(ks[0], shp, dtype=jnp.float32)
        b = 0.1 * jax.random.normal(ks[1], (cout,), dtype=jnp.float32)
        g = 1.0 + 0.1 * jax.random.normal(ks[2], (cout,), dtype=jnp.float32)
        beta = 0.05 * jax.random.normal(ks[3], (cout,), dtype=jnp.float32)
        mean = 0.1 * jax.random.normal(ks[4], (cout,), dtype=jnp.float32)
        var = jax.random.uniform(ks[5], (cout,), dtype=jnp.float32,
                                 minval=0.5, maxval=1.5)
        params.append((w, b, g, beta, mean, var))
    return params


if __name__ == "__main__":
    key = jax.random.PRNGKey(0)
    k_x, k_p = jax.random.split(key)

    N, c1, L = 2, 32, 64          # ResBlock(c1=32): c1//2 = 16
    k, pad = 5, 2

    x = jax.random.normal(k_x, (N, c1, L), dtype=jnp.float32)
    params = _make_params(k_p, c1, k)

    ref = _reference(x, params, k=k, pad=pad)

    # f32 operand path (default)
    out = jax.block_until_ready(resblock(x, params, k=k, pad=pad))
    assert out.shape == (N, c1, L), out.shape
    max_err = float(jnp.max(jnp.abs(out - ref)))
    assert jnp.allclose(out, ref, atol=5e-4, rtol=5e-4), max_err

    # bf16 MXU-operand path (v6e/v7x-native); looser tolerance by construction
    out_bf16 = jax.block_until_ready(
        resblock(x, params, k=k, pad=pad, compute_dtype=jnp.bfloat16))
    max_err_bf16 = float(jnp.max(jnp.abs(out_bf16 - ref)))
    assert jnp.allclose(out_bf16, ref, atol=0.3, rtol=0.05), max_err_bf16

    print("KERNEL_OK")
</pallas_src>

<mosaic_0001>
module attributes {stable_mosaic.version = 11 : i64} {
  func.func @_resblock_kernel(%arg0: i32, %arg1: memref<1x32x64xf32, #tpu.memory_space<vmem>>, %arg2: memref<16x32xf32, #tpu.memory_space<vmem>>, %arg3: memref<16x1xf32, #tpu.memory_space<vmem>>, %arg4: memref<80x16xf32, #tpu.memory_space<vmem>>, %arg5: memref<16x1xf32, #tpu.memory_space<vmem>>, %arg6: memref<32x16xf32, #tpu.memory_space<vmem>>, %arg7: memref<32x1xf32, #tpu.memory_space<vmem>>, %arg8: memref<1x32x64xf32, #tpu.memory_space<vmem>>) attributes {dimension_semantics = [#tpu.dimension_semantics<parallel>], iteration_bounds = array<i64: 2>, scalar_prefetch = 0 : i64, scratch_operands = 0 : i64, tpu.core_type = #tpu.core_type<tc>, window_params = [{transform_indices = @transform_0, window_bounds = array<i64: 1, 32, 64>}, {pipeline_mode = #tpu.pipeline_mode<synchronous>, transform_indices = @transform_1, window_bounds = array<i64: 16, 32>}, {pipeline_mode = #tpu.pipeline_mode<synchronous>, transform_indices = @transform_2, window_bounds = array<i64: 16, 1>}, {pipeline_mode = #tpu.pipeline_mode<synchronous>, transform_indices = @transform_3, window_bounds = array<i64: 80, 16>}, {pipeline_mode = #tpu.pipeline_mode<synchronous>, transform_indices = @transform_4, window_bounds = array<i64: 16, 1>}, {pipeline_mode = #tpu.pipeline_mode<synchronous>, transform_indices = @transform_5, window_bounds = array<i64: 32, 16>}, {pipeline_mode = #tpu.pipeline_mode<synchronous>, transform_indices = @transform_6, window_bounds = array<i64: 32, 1>}, {transform_indices = @transform_7, window_bounds = array<i64: 1, 32, 64>}]} {
    %c0 = arith.constant 0 : index
    %c0_0 = arith.constant 0 : index
    %0 = vector.load %arg2[%c0, %c0_0] : memref<16x32xf32, #tpu.memory_space<vmem>>, vector<16x32xf32>
    %c0_1 = arith.constant 0 : index
    %c0_2 = arith.constant 0 : index
    %1 = vector.load %arg4[%c0_1, %c0_2] : memref<80x16xf32, #tpu.memory_space<vmem>>, vector<80x16xf32>
    %c0_3 = arith.constant 0 : index
    %c0_4 = arith.constant 0 : index
    %2 = vector.load %arg6[%c0_3, %c0_4] : memref<32x16xf32, #tpu.memory_space<vmem>>, vector<32x16xf32>
    %c0_5 = arith.constant 0 : index
    %c0_6 = arith.constant 0 : index
    %3 = vector.load %arg3[%c0_5, %c0_6] : memref<16x1xf32, #tpu.memory_space<vmem>>, vector<16x1xf32>
    %c0_7 = arith.constant 0 : index
    %c0_8 = arith.constant 0 : index
    %4 = vector.load %arg5[%c0_7, %c0_8] : memref<16x1xf32, #tpu.memory_space<vmem>>, vector<16x1xf32>
    %c0_9 = arith.constant 0 : index
    %c0_10 = arith.constant 0 : index
    %5 = vector.load %arg7[%c0_9, %c0_10] : memref<32x1xf32, #tpu.memory_space<vmem>>, vector<32x1xf32>
    %c0_11 = arith.constant 0 : index
    %c0_12 = arith.constant 0 : index
    %c0_13 = arith.constant 0 : index
    %6 = vector.load %arg1[%c0_11, %c0_12, %c0_13] : memref<1x32x64xf32, #tpu.memory_space<vmem>>, vector<1x32x64xf32>
    %7 = vector.shape_cast %6 : vector<1x32x64xf32> to vector<32x64xf32>
    %cst = arith.constant dense<0.000000e+00> : vector<16x64xf32>
    %8 = tpu.matmul %0, %7, %cst {dimension_numbers = #tpu.dot_dimension_numbers<[1], [0], [0], [1], [0, 0, 1, 1], [], []>} : vector<16x32xf32>, vector<32x64xf32>, vector<16x64xf32> -> vector<16x64xf32>
    %9 = vector.broadcast %3 : vector<16x1xf32> to vector<16x64xf32>
    %10 = arith.addf %8, %9 : vector<16x64xf32>
    %cst_14 = arith.constant 0.000000e+00 : f32
    %11 = vector.broadcast %cst_14 : f32 to vector<16x64xf32>
    %12 = arith.maximumf %10, %11 : vector<16x64xf32>
    %cst_15 = arith.constant dense<0.000000e+00> : vector<80x64xf32>
    %13 = tpu.matmul %1, %12, %cst_15 {dimension_numbers = #tpu.dot_dimension_numbers<[1], [0], [0], [1], [0, 0, 1, 1], [], []>} : vector<80x16xf32>, vector<16x64xf32>, vector<80x64xf32> -> vector<80x64xf32>
    %14 = vector.extract_strided_slice %13 {offsets = [32, 0], sizes = [16, 64], strides = [1, 1]} : vector<80x64xf32> to vector<16x64xf32>
    %15 = vector.extract_strided_slice %13 {offsets = [0, 0], sizes = [16, 64], strides = [1, 1]} : vector<80x64xf32> to vector<16x64xf32>
    %cst_16 = arith.constant 0.000000e+00 : f32
    %16 = vector.broadcast %cst_16 : f32 to vector<16x2xf32>
    %17 = vector.extract_strided_slice %15 {offsets = [0, 0], sizes = [16, 62], strides = [1, 1]} : vector<16x64xf32> to vector<16x62xf32>
    %18 = tpu.concatenate %16, %17 in 1 : vector<16x2xf32>, vector<16x62xf32> -> vector<16x64xf32>
    %19 = arith.addf %14, %18 : vector<16x64xf32>
    %20 = vector.extract_strided_slice %13 {offsets = [16, 0], sizes = [16, 64], strides = [1, 1]} : vector<80x64xf32> to vector<16x64xf32>
    %cst_17 = arith.constant 0.000000e+00 : f32
    %21 = vector.broadcast %cst_17 : f32 to vector<16x1xf32>
    %22 = vector.extract_strided_slice %20 {offsets = [0, 0], sizes = [16, 63], strides = [1, 1]} : vector<16x64xf32> to vector<16x63xf32>
    %23 = tpu.concatenate %21, %22 in 1 : vector<16x1xf32>, vector<16x63xf32> -> vector<16x64xf32>
    %24 = arith.addf %19, %23 : vector<16x64xf32>
    %25 = vector.extract_strided_slice %13 {offsets = [48, 0], sizes = [16, 64], strides = [1, 1]} : vector<80x64xf32> to vector<16x64xf32>
    %26 = vector.extract_strided_slice %25 {offsets = [0, 1], sizes = [16, 63], strides = [1, 1]} : vector<16x64xf32> to vector<16x63xf32>
    %cst_18 = arith.constant 0.000000e+00 : f32
    %27 = vector.broadcast %cst_18 : f32 to vector<16x1xf32>
    %28 = tpu.concatenate %26, %27 in 1 : vector<16x63xf32>, vector<16x1xf32> -> vector<16x64xf32>
    %29 = arith.addf %24, %28 : vector<16x64xf32>
    %30 = vector.extract_strided_slice %13 {offsets = [64, 0], sizes = [16, 64], strides = [1, 1]} : vector<80x64xf32> to vector<16x64xf32>
    %31 = vector.extract_strided_slice %30 {offsets = [0, 2], sizes = [16, 62], strides = [1, 1]} : vector<16x64xf32> to vector<16x62xf32>
    %cst_19 = arith.constant 0.000000e+00 : f32
    %32 = vector.broadcast %cst_19 : f32 to vector<16x2xf32>
    %33 = tpu.concatenate %31, %32 in 1 : vector<16x62xf32>, vector<16x2xf32> -> vector<16x64xf32>
    %34 = arith.addf %29, %33 : vector<16x64xf32>
    %35 = vector.broadcast %4 : vector<16x1xf32> to vector<16x64xf32>
    %36 = arith.addf %34, %35 : vector<16x64xf32>
    %cst_20 = arith.constant 0.000000e+00 : f32
    %37 = vector.broadcast %cst_20 : f32 to vector<16x64xf32>
    %38 = arith.maximumf %36, %37 : vector<16x64xf32>
    %cst_21 = arith.constant dense<0.000000e+00> : vector<32x64xf32>
    %39 = tpu.matmul %2, %38, %cst_21 {dimension_numbers = #tpu.dot_dimension_numbers<[1], [0], [0], [1], [0, 0, 1, 1], [], []>} : vector<32x16xf32>, vector<16x64xf32>, vector<32x64xf32> -> vector<32x64xf32>
    %40 = vector.broadcast %5 : vector<32x1xf32> to vector<32x64xf32>
    %41 = arith.addf %39, %40 : vector<32x64xf32>
    %cst_22 = arith.constant 0.000000e+00 : f32
    %42 = vector.broadcast %cst_22 : f32 to vector<32x64xf32>
    %43 = arith.maximumf %41, %42 : vector<32x64xf32>
    %c0_23 = arith.constant 0 : index
    %c0_24 = arith.constant 0 : index
    %c0_25 = arith.constant 0 : index
    %44 = vector.load %arg1[%c0_23, %c0_24, %c0_25] : memref<1x32x64xf32, #tpu.memory_space<vmem>>, vector<1x32x64xf32>
    %45 = vector.shape_cast %44 : vector<1x32x64xf32> to vector<32x64xf32>
    %46 = arith.addf %43, %45 : vector<32x64xf32>
    %c0_26 = arith.constant 0 : index
    %c0_27 = arith.constant 0 : index
    %c0_28 = arith.constant 0 : index
    %47 = vector.load %arg8[%c0_26, %c0_27, %c0_28] : memref<1x32x64xf32, #tpu.memory_space<vmem>>, vector<1x32x64xf32>
    %48 = vector.shape_cast %47 : vector<1x32x64xf32> to vector<32x64xf32>
    %49 = vector.shape_cast %46 : vector<32x64xf32> to vector<1x32x64xf32>
    tpu.vector_store %arg8[%c0_26, %c0_27, %c0_28], %49 {strides = array<i32>} : memref<1x32x64xf32, #tpu.memory_space<vmem>>, vector<1x32x64xf32>,
    return
  }
  func.func @transform_0(%arg0: i32) -> (i32, i32, i32) {
    %c0_i32 = arith.constant 0 : i32
    %c0_i32_0 = arith.constant 0 : i32
    %c0_i32_1 = arith.constant 0 : i32
    return %arg0, %c0_i32, %c0_i32_0 : i32, i32, i32
  }
  func.func @transform_1(%arg0: i32) -> (i32, i32) {
    %c0_i32 = arith.constant 0 : i32
    %c0_i32_0 = arith.constant 0 : i32
    %c0_i32_1 = arith.constant 0 : i32
    return %c0_i32, %c0_i32_0 : i32, i32
  }
  func.func @transform_2(%arg0: i32) -> (i32, i32) {
    %c0_i32 = arith.constant 0 : i32
    %c0_i32_0 = arith.constant 0 : i32
    %c0_i32_1 = arith.constant 0 : i32
    return %c0_i32, %c0_i32_0 : i32, i32
  }
  func.func @transform_3(%arg0: i32) -> (i32, i32) {
    %c0_i32 = arith.constant 0 : i32
    %c0_i32_0 = arith.constant 0 : i32
    %c0_i32_1 = arith.constant 0 : i32
    return %c0_i32, %c0_i32_0 : i32, i32
  }
  func.func @transform_4(%arg0: i32) -> (i32, i32) {
    %c0_i32 = arith.constant 0 : i32
    %c0_i32_0 = arith.constant 0 : i32
    %c0_i32_1 = arith.constant 0 : i32
    return %c0_i32, %c0_i32_0 : i32, i32
  }
  func.func @transform_5(%arg0: i32) -> (i32, i32) {
    %c0_i32 = arith.constant 0 : i32
    %c0_i32_0 = arith.constant 0 : i32
    %c0_i32_1 = arith.constant 0 : i32
    return %c0_i32, %c0_i32_0 : i32, i32
  }
  func.func @transform_6(%arg0: i32) -> (i32, i32) {
    %c0_i32 = arith.constant 0 : i32
    %c0_i32_0 = arith.constant 0 : i32
    %c0_i32_1 = arith.constant 0 : i32
    return %c0_i32, %c0_i32_0 : i32, i32
  }
  func.func @transform_7(%arg0: i32) -> (i32, i32, i32) {
    %c0_i32 = arith.constant 0 : i32
    %c0_i32_0 = arith.constant 0 : i32
    %c0_i32_1 = arith.constant 0 : i32
    return %arg0, %c0_i32, %c0_i32_0 : i32, i32, i32
  }
}

</mosaic_0001>

<bundles_post_ra>
// kernel: tpu_custom_call.1
= control target key start
LH: loop header
LB: loop body
LE: loop exit
PB: predicated region body
PF: predicated region fallthrough
CT: control target
= control target key end

     0   :  { %12 = vsyncpa [#allocation3], 0  ;;  %s1032_s0 = inlined_call_operand.vmem [shape: f32[2,32,64], index: 0, kind: input, shape index: {}]   ;;  %s1033_s1 = inlined_call_operand.vmem [shape: f32[16,32], index: 1, kind: input, shape index: {}]   ;;  %s1034_s2 = inlined_call_operand.vmem [shape: f32[16,1], index: 2, kind: input, shape index: {}]   ;;  %s1035_s3 = inlined_call_operand.vmem [shape: f32[80,16], index: 3, kind: input, shape index: {}]   ;;  %s1036_s4 = inlined_call_operand.vmem [shape: f32[16,1], index: 4, kind: input, shape index: {}]   ;;  %s1037_s5 = inlined_call_operand.vmem [shape: f32[32,16], index: 5, kind: input, shape index: {}]   ;;  %s1038_s6 = inlined_call_operand.vmem [shape: f32[32,1], index: 6, kind: input, shape index: {}]   ;;  %s1039_s7 = inlined_call_operand.hbm [shape: f32[2,32,64], index: 7, kind: output, shape index: {}]  }
   0x1   :  { %14 = vsyncpa [#allocation3 + $0x1], 0  ;;  %s835_s24 = smov 0   ;;  %s837_s25 = smov 0  }
   0x2   :  { %s839_s26 = smov 0   ;;  %s841_s27 = smov 0  }
   0x3 LB: > { %s856_s28 = sadd.s32 4294967295, %s786_s27   ;;  %s643_s29 = sadd.s32 4294967294, %s786_s27   ;;  %s786_s27 = sphi %s841_s27, %s1045_s27   ;;  %s782_s26 = sphi %s839_s26, %s1044_s26   ;;  %s778_s25 = sphi %s837_s25, %s1043_s25   ;;  %s774_s24 = sphi %s835_s24, %s1042_s24  }
   0x4   : > { %s860_s30 = sadd.s32 1, %s786_s27   ;;  %s179_s8 = sadd.s32 1, %s782_s26 }
   0x5   : > { %s176_s9 = ssub.s32 %s786_s27, %s860_s30  ;;  %p189_p0 = scmp.ne.s32.totalorder %s782_s26, %s778_s25 }
   0x6   : > { %p177_p1 = scmp.eq.s32.totalorder %s176_s9, 0  ;;  %p190_p2 = scmp.eq.s32.totalorder %s856_s28, 1 }
   0x7   : > { %p195_p3 = scmp.ne.s32.totalorder %s778_s25, %s774_s24  ;;  %p196_p4 = scmp.eq.s32.totalorder %s643_s29, 1 }
   0x8   : > { %s871_s10 = scalar_select %p177_p1, %s782_s26, %s179_s8  }
   0x9   : > { %p873_p5 = por %p190_p2, %p189_p0  ;;  %p877_p6 = por %p196_p4, %p195_p3 }
   0xa   : > { %p646_p7 = scmp.ge.s32.totalorder %s786_s27, 1  ;;  %p240_p8 = scmp.lt.s32.totalorder %s786_s27, 3 }
   0xc   : > { %p241_p9 = pnand %p646_p7, %p240_p8 }
   0xd   : > { %p272_p10 = scmp.lt.s32.totalorder (!%p241_p9), %s856_s28, 1  ;;  %s789_s18 = smov (!%p241_p9), 2  }
   0xe   : > { %244 = sbr.rel (%p241_p9) target bundleno = 617 (0x269), region = 48  ;;  %s791_s20 = smov (!%p241_p9), 1  }
   0xf   : > { %s792_s8 = smov (!%p241_p9), 126   ;;  %s269_s14 = sand.u32 (!%p241_p9), 1, %s778_s25  }
  0x10   : > { %s672_s17 = sshll.u32 (!%p241_p9), %s856_s28, 5  ;;  %s744_s13 = scalar_lea.hbm (!%p241_p9), %s1039_s7, 64 }
  0x13   : > { %v294_v0 = vld [vmem:[%s1034_s2 + $0x8] sm:$0xff]  ;;  %v788_v1 = vmov 0   ;;  %s273_s15 = scalar_select %p272_p10, %s856_s28, 1  ;;  %v293_v4 = vld [vmem:[%s1034_s2] sm:$0xff]  ;;  %vm315_vm0 = vcmask 261120   ;;  %vm347_vm1 = vcmask 130048  }
  0x14   : > { %721 = vset.pattern.permute.xlu0 %v788_v1  ;;  %722 = vset.pattern.permute.xlu1 %v788_v1  ;;  %v277_v7 = vld [vmem:[%s1033_s1] sm:$0xff]  ;;  %v278_v8 = vld [vmem:[%s1033_s1 + $0x8] sm:$0xff]  ;;  %v285_v20 = vld [vmem:[%s1035_s3 + $0x30] sm:$0xff]  ;;  %vm433_vm2 = vcmask 15360   ;;  %vm446_vm3 = vcmask 7168   ;;  %vm472_vm4 = vcmask 506880  }
  0x15   : > { %312 = vperm.xlu0 %721, %v294_v0   ;;  %723 = vset.pattern.permute.xlu2 %v788_v1  ;;  %s671_s16 = sshll.u32 %s273_s15, 5  ;;  %v279_v17 = vld [vmem:[%s1035_s3] sm:$0xff]  ;;  %v284_v18 = vld [vmem:[%s1035_s3 + $0x28] sm:$0xff]  ;;  %v286_v21 = vld [vmem:[%s1035_s3 + $0x38] sm:$0xff]  ;;  %vm459_vm5 = vcmask 515072   ;;  %s647_s15 = sshll.u32 %s269_s14, 5 }
  0x16   : > { %s276_s19 = scalar_lea.vmem %s1032_s0, %s671_s16  ;;  %v280_v19 = vld [vmem:[%s1035_s3 + $0x8] sm:$0xff]  ;;  %v281_v22 = vld [vmem:[%s1035_s3 + $0x10] sm:$0xff]  ;;  %v287_v23 = vld [vmem:[%s1035_s3 + $0x40] sm:$0xff]  ;;  %vm560_vm6 = vcmask 523264   ;;  %s271_s16 = scalar_lea.vmem [#allocation2], %s647_s15 }
  0x17   : > { %v891_v2 = vld [vmem:[%s276_s19 + $0x18] sm:$0xff]  ;;  %v893_v3 = vld [vmem:[%s276_s19 + $0x10] sm:$0xff]  ;;  %v899_v5 = vld [vmem:[%s276_s19 + $0x8] sm:$0xff]  ;;  %s578_s21 = sshll.u32 %s271_s16, 4  ;;  %s566_s28 = scalar_lea.sflag [#allocation3], %s269_s14  ;;  %s579_s21 = int_to_ptr.vmem [resolvable:$true] %s578_s21 }
  0x18   : > { %334 = vmatpush.msra.mxu0 %v891_v2  ;;  %v902_v6 = vld [vmem:[%s276_s19] sm:$0xff]  ;;  %v282_v24 = vld [vmem:[%s1035_s3 + $0x18] sm:$0xff]  ;;  %v288_v25 = vld [vmem:[%s1035_s3 + $0x48] sm:$0xff]  ;;  %s790_s19 = smov 127  }
  0x19   : > { %v283_v26 = vld [vmem:[%s1035_s3 + $0x20] sm:$0xff]  ;;  %v296_v33 = vld [vmem:[%s1036_s4 + $0x8] sm:$0xff]  ;;  %v300_v39 = vld [vmem:[%s1038_s6 + $0x18] sm:$0xff] }
  0x1a   : > { %335 = vmatpush.msra.mxu0 %v893_v3  ;;  %v298_v36 = vld [vmem:[%s1038_s6 + $0x8] sm:$0xff]  ;;  %v297_v37 = vld [vmem:[%s1038_s6] sm:$0xff]  ;;  %v299_v41 = vld [vmem:[%s1038_s6 + $0x10] sm:$0xff] }
  0x1b   : > { %v295_v40 = vld [vmem:[%s1036_s4] sm:$0xff] }
  0x1c   : > { %336 = vmatpush.msra.mxu0 %v899_v5 }
  0x1d   : > { %307 = vperm.xlu0 %721, %v293_v4  }
  0x1e   : > { %337 = vmatpush.msra.mxu0 %v902_v6 }
  0x1f   : > { %650 = vmatmul.msk.f32.vlgmr.msra.gmra.mxu0 %vm315_vm0, %v277_v7 }
  0x27   : > { %651 = vmatmul.msk.f32.gmra.mxu0 %vm315_vm0, %v278_v8 }
  0x87   : > { %v313_v9 = vpop.permute.xlu0 %312 }
  0x8f   : > { %v308_v11 = vpop.permute.xlu0 %307 }
  0x9c   : > { %v339_v10 = vpop.f32.mrf.mxu0 }
  0x9d   : > { %v340_v13 = vadd.f32 %v339_v10, %v308_v11 }
  0x9f   : > { %v345_v16 = vmax.f32 %v340_v13, 0.0  ;;  %v289_v13 = vld [vmem:[%s1037_s5] sm:$0xff] }
  0xa4   : > { %v342_v12 = vpop.f32.mrf.mxu0 }
  0xa5   : > { %v343_v14 = vadd.f32 %v342_v12, %v313_v9 }
  0xa7   : > { %v346_v15 = vmax.f32 %v343_v14, 0.0  ;;  %v290_v14 = vld [vmem:[%s1037_s5 + $0x8] sm:$0xff] }
  0xa9   : > { %392 = vmatpush.msra.mxu1 %v346_v15  ;;  %673 = vmatpush.msra.mxu3 %v346_v15  ;;  %v291_v15 = vld [vmem:[%s1037_s5 + $0x10] sm:$0xff] }
  0xab   : > { %393 = vmatpush.msra.mxu1 %v345_v16  ;;  %674 = vmatpush.msra.mxu3 %v345_v16  ;;  %v292_v16 = vld [vmem:[%s1037_s5 + $0x18] sm:$0xff] }
  0xac   : > { %652 = vmatmul.msk.f32.vlgmr.msra.gmra.mxu1 %vm347_vm1, %v279_v17  ;;  %657 = vmatmul.msk.f32.vlgmr.msra.gmra.mxu3 %vm347_vm1, %v284_v18 }
  0xb4   : > { %653 = vmatmul.msk.f32.gmra.mxu1 %vm347_vm1, %v280_v19  ;;  %658 = vmatmul.msk.f32.gmra.mxu3 %vm347_vm1, %v285_v20 }
  0xbc   : > { %659 = vmatmul.msk.f32.gmra.mxu3 %vm347_vm1, %v286_v21  ;;  %654 = vmatmul.msk.f32.gmra.mxu1 %vm347_vm1, %v281_v22 }
  0xc4   : > { %660 = vmatmul.msk.f32.gmra.mxu3 %vm347_vm1, %v287_v23  ;;  %655 = vmatmul.msk.f32.gmra.mxu1 %vm347_vm1, %v282_v24 }
  0xcc   : > { %661 = vmatmul.msk.f32.gmra.mxu3 %vm347_vm1, %v288_v25  ;;  %656 = vmatmul.msk.f32.gmra.mxu1 %vm347_vm1, %v283_v26 }
 0x129   : > { %v395_v27 = vpop.f32.mrf.mxu1 }
 0x12a   : > { %427 = vrot.lane.b32.xlu1 %v395_v27, %s789_s18 }
 0x12f   : > { %v410_v28 = vpop.f32.mrf.mxu3 }
 0x131   : > { %v398_v29 = vpop.f32.mrf.mxu1 }
 0x132   : > { %429 = vrot.lane.b32.xlu1 %v398_v29, %s789_s18 }
 0x137   : > { %v413_v30 = vpop.f32.mrf.mxu3 }
 0x139   : > { %v401_v31 = vpop.f32.mrf.mxu1 }
 0x13a   : > { %453 = vrot.lane.b32.xlu1 %v413_v30, %s790_s19  ;;  %440 = vrot.lane.b32.xlu2 %v401_v31, %s791_s20 }
 0x13f   : > { %v416_v32 = vpop.f32.mrf.mxu3 }
 0x140   : > { %455 = vrot.lane.b32.xlu0 %v416_v32, %s790_s19 }
 0x141   : > { %v404_v34 = vpop.f32.mrf.mxu1 }
 0x142   : > { %484 = vperm.xlu1 %722, %v296_v33   ;;  %442 = vrot.lane.b32.xlu2 %v404_v34, %s791_s20  ;;  %s577_s20 = scalar_lea.hbm %s1039_s7, %s672_s17 }
 0x143   : > { %s580_s22 = sshll.u32 %s577_s20, 4  ;;  %s581_s22 = int_to_ptr.hbm [resolvable:$true] %s580_s22 }
 0x144   : > { %s738_s23 = sshra.s32 %s581_s22, 4  ;;  %s739_s23 = int_to_ptr.hbm [resolvable:$true] %s738_s23 }
 0x145   : > { %s740_s29 = scalar_lea.hbm %s739_s23, 32  ;;  %p745_p0 = scmp.lt.s32.totalorder %s739_s23, %s1039_s7 }
 0x146   : > { %p741_p11 = scmp.ne.s32.totalorder %s739_s23, %s740_s29  ;;  %p746_p1 = scmp.lt.s32.totalorder %s744_s13, %s740_s29 }
 0x147   : > { %v419_v35 = vpop.f32.mrf.mxu3 }
 0x148   : > { %466 = vrot.lane.b32.xlu0 %v419_v35, %s792_s8  ;;  %p742_p12 = pnand %p741_p11, %p873_p5  ;;  %p747_p2 = por %p746_p1, %p745_p0 }
 0x149   : > { %v407_v51 = vpop.f32.mrf.mxu1 }
 0x14a   : > { %498 = vperm.xlu1 %722, %v298_v36   ;;  %p743_p13 = pneg %p742_p12 }
 0x14c   : > { %p748_p3 = pnand %p747_p2, %p743_p13 }
 0x14f   : > { %v422_v38 = vpop.f32.mrf.mxu3 }
 0x150   : > { %493 = vperm.xlu0 %721, %v297_v37   ;;  %468 = vrot.lane.b32.xlu2 %v422_v38, %s792_s8 }
 0x158   : > { %508 = vperm.xlu0 %721, %v300_v39   ;;  %479 = vperm.xlu2 %723, %v295_v40  }
 0x160   : > { %503 = vperm.xlu2 %723, %v299_v41  }
 0x194   : > { %v441_v43 = vpop.permute.xlu2 %440 }
 0x195   : > { %v447_v59 = vsel %vm446_vm3, 0.0, %v441_v43 }
 0x19c   : > { %v428_v42 = vpop.permute.xlu1 %427  ;;  %v443_v45 = vpop.permute.xlu2 %442 }
 0x19d   : > { %v448_v49 = vsel %vm446_vm3, 0.0, %v443_v45  ;;  %v434_v50 = vsel %vm433_vm2, 0.0, %v428_v42 }
 0x19e   : > { %v436_v57 = vadd.f32 %v434_v50, %v407_v51 }
 0x1a0   : > { %v449_v63 = vadd.f32 %v447_v59, %v436_v57 }
 0x1a4   : > { %v430_v44 = vpop.permute.xlu1 %429 }
 0x1a5   : > { %v435_v46 = vsel %vm433_vm2, 0.0, %v430_v44 }
 0x1a6   : > { %v437_v48 = vadd.f32 %v435_v46, %v410_v28 }
 0x1a8   : > { %v450_v52 = vadd.f32 %v448_v49, %v437_v48 }
 0x1aa   : > { %v469_v53 = vpop.permute.xlu2 %468 }
 0x1ab   : > { %v474_v55 = vsel %vm472_vm4, %v469_v53, 0.0 }
 0x1ac   : > { %v454_v47 = vpop.permute.xlu1 %453 }
 0x1ad   : > { %v460_v61 = vsel %vm459_vm5, %v454_v47, 0.0 }
 0x1ae   : > { %v462_v1 = vadd.f32 %v460_v61, %v449_v63 }
 0x1b2   : > { %v456_v54 = vpop.permute.xlu0 %455  ;;  %v480_v10 = vpop.permute.xlu2 %479 }
 0x1b3   : > { %v461_v56 = vsel %vm459_vm5, %v456_v54, 0.0 }
 0x1b4   : > { %v463_v58 = vadd.f32 %v461_v56, %v450_v52  ;;  %v485_v62 = vpop.permute.xlu1 %484 }
 0x1b6   : > { %v476_v60 = vadd.f32 %v474_v55, %v463_v58 }
 0x1b8   : > { %v488_v0 = vadd.f32 %v485_v62, %v476_v60 }
 0x1ba   : > { %v467_v4 = vpop.permute.xlu0 %466  ;;  %v490_v7 = vmax.f32 %v488_v0, 0.0  ;;  %v504_v27 = vpop.permute.xlu2 %503 }
 0x1bb   : > { %v473_v8 = vsel %vm472_vm4, %v467_v4, 0.0 }
 0x1bc   : > { %v475_v9 = vadd.f32 %v473_v8, %v462_v1  ;;  %537 = vmatpush.msra.mxu2 %v490_v7  ;;  %v499_v22 = vpop.permute.xlu1 %498 }
 0x1be   : > { %v487_v11 = vadd.f32 %v480_v10, %v475_v9 }
 0x1c0   : > { %v489_v12 = vmax.f32 %v487_v11, 0.0 }
 0x1c2   : > { %538 = vmatpush.msra.mxu2 %v489_v12  ;;  %v494_v17 = vpop.permute.xlu0 %493 }
 0x1c3   : > { %662 = vmatmul.msk.f32.vlgmr.msra.gmra.mxu2 %vm347_vm1, %v289_v13 }
 0x1cb   : > { %663 = vmatmul.msk.f32.gmra.mxu2 %vm347_vm1, %v290_v14 }
 0x1d3   : > { %664 = vmatmul.msk.f32.gmra.mxu2 %vm347_vm1, %v291_v15 }
 0x1db   : > { %665 = vmatmul.msk.f32.gmra.mxu2 %vm347_vm1, %v292_v16 }
 0x246   : > { %v540_v18 = vpop.f32.mrf.mxu2 }
 0x247   : > { %v541_v19 = vadd.f32 %v540_v18, %v494_v17 }
 0x249   : > { %v552_v20 = vmax.f32 %v541_v19, 0.0 }
 0x24b   : > { %v556_v21 = vadd.f32 %v552_v20, %v902_v6  ;;  %v509_v6 = vpop.permute.xlu0 %508 }
 0x24d   : > { %561 = vst.msk [vmem:[%s271_s16] sm:$0xff] %vm560_vm6, %v556_v21 }
 0x24e   : > { %v543_v23 = vpop.f32.mrf.mxu2 }
 0x24f   : > { %v544_v24 = vadd.f32 %v543_v23, %v499_v22 }
 0x251   : > { %v553_v25 = vmax.f32 %v544_v24, 0.0 }
 0x253   : > { %v557_v26 = vadd.f32 %v553_v25, %v899_v5 }
 0x255   : > { %562 = vst.msk [vmem:[%s271_s16 + $0x8] sm:$0xff] %vm560_vm6, %v557_v26 }
 0x256   : > { %v546_v28 = vpop.f32.mrf.mxu2 }
 0x257   : > { %v547_v29 = vadd.f32 %v546_v28, %v504_v27 }
 0x259   : > { %v554_v30 = vmax.f32 %v547_v29, 0.0 }
 0x25b   : > { %v558_v31 = vadd.f32 %v554_v30, %v893_v3 }
 0x25d   : > { %563 = vst.msk [vmem:[%s271_s16 + $0x10] sm:$0xff] %vm560_vm6, %v558_v31 }
 0x25e   : > { %v549_v32 = vpop.f32.mrf.mxu2 }
 0x25f   : > { %v550_v5 = vadd.f32 %v549_v32, %v509_v6 }
 0x261   : > { %v555_v33 = vmax.f32 %v550_v5, 0.0 }
 0x263   : > { %v559_v34 = vadd.f32 %v555_v33, %v891_v2 }
 0x265   : > { %564 = vst.msk [vmem:[%s271_s16 + $0x18] sm:$0xff] %vm560_vm6, %v559_v34 }
 0x266   : > { %751 = shalt.err (!%p748_p3)
}
 0x267   : > { %s793_s14 = smov 128   ;;  %s794_s16 = smov 8  }
 0x268   : > { %675 = dma.vmem_to_hbm [thread:$0]  (%p873_p5), %s579_s21, 512, %s581_s22, %s566_s28, %s793_s14, %s793_s14, %s794_s16  }
 0x269 PF: > { %p681_p4 = scmp.ge.s32.totalorder %s786_s27, 2  ;;  %s595_s18 = sand.u32 1, %s774_s24  }
 0x26a   : > { %s596_s19 = scalar_lea.sflag [#allocation3], %s595_s18 }
 0x26b   : > { %p678_p7 = pnand %p681_p4, %p877_p6 }
 0x26d   : > { %p679_p8 = pneg %p678_p7 }
 0x26f   : > { %769 = dma.done.wait (%p679_p8), %s596_s19, 512  }
 0x270   : > { %771 = vsyncadd (%p679_p8), %s596_s19, 4294966784  ;;  %p17_p9 = scmp.ge.s32.totalorder %s860_s30, 4   ;;  %s1042_s24 = smov %s778_s25 }
 0x271   : > { %s1043_s25 = smov %s782_s26  ;;  %s1044_s26 = smov %s871_s10 }
 0x272   : > { %s1045_s27 = smov %s860_s30  ;;  %19 = sbr.rel (!%p17_p9) target bundleno = 3 (0x3), region = 83 }
 0x277   :  { %602 = vsyncpa [#allocation3], 1 }
 0x278   :  { %604 = vsyncpa [#allocation3 + $0x1], 1 }

</bundles_post_ra>
